<compile_context>
chip_gen: v7x
topology: tpu7x:2x2x1
jax: 0.10.0
libtpu: 0.0.40
codegen_flags: <defaults>
</compile_context>

<pallas_src>
from functools import partial

import jax
import jax.numpy as jnp
from jax import lax
from jax.experimental import pallas as pl
from jax.experimental.pallas import tpu as pltpu


def _patch_merge_kernel(patches_ref, tokens_ref, gamma_ref, beta_ref,
                        w_red_ref, w_up_ref, out_p_ref, out_t_ref, *, eps):
    """Fused LayerNorm + reduction matmul (+ token up-projection on step 0).

    patches_ref: (tm, 4D)  2x2-merged patch features, batch folded into rows
    tokens_ref : (B, D)    class tokens
    gamma_ref  : (1, 4D)   LayerNorm weight
    beta_ref   : (1, 4D)   LayerNorm bias
    w_red_ref  : (4D, 2D)  reduction weight (= torch weight.T), matmul dtype
    w_up_ref   : (D, 2D)   up-projection weight (= torch weight.T), matmul dtype
    out_p_ref  : (tm, 2D)  merged-patch output
    out_t_ref  : (B, 2D)   class-token output
    """
    # LayerNorm over the 4D channel axis, computed in f32.
    x = patches_ref[...].astype(jnp.float32)                    # (tm, 4D)
    mu = jnp.mean(x, axis=-1, keepdims=True)
    xc = x - mu
    var = jnp.mean(xc * xc, axis=-1, keepdims=True)
    inv = lax.rsqrt(var + eps)                                   # EUP slot
    ln = xc * inv * gamma_ref[...] + beta_ref[...]               # (tm, 4D)

    # Reduction Linear(4D -> 2D): bf16 operands, f32 accumulation on the MXU.
    out_p_ref[...] = jnp.dot(
        ln.astype(w_red_ref.dtype), w_red_ref[...],
        preferred_element_type=jnp.float32).astype(out_p_ref.dtype)

    # Class-token up-projection Linear(D -> 2D). Tiny; do it on step 0 only
    # (the token output block is grid-resident, written back at the end).
    @pl.when(pl.program_id(0) == 0)
    def _():
        t = tokens_ref[...].astype(w_up_ref.dtype)               # (B, D)
        out_t_ref[...] = jnp.dot(
            t, w_up_ref[...],
            preferred_element_type=jnp.float32).astype(out_t_ref.dtype)


def _pick_m_tile(m):
    """Largest clean tile along the folded (B * H/2 * W/2) row axis."""
    if m <= 512:
        return m
    for t in (512, 256, 128, 64, 32, 16, 8):
        if m % t == 0:
            return t
    return m


def patch_merging_scale_pallas(x, gamma, beta, w_red, w_up, *, hw, eps=1e-5,
                               matmul_dtype=jnp.bfloat16):
    """One PatchMerging scale.

    x     : (B, 1 + H*W, D)  with H = W = hw
    gamma : (4D,)  LayerNorm weight      beta : (4D,)  LayerNorm bias
    w_red : (4D, 2D)  reduction weight (torch .weight.T, bias-free)
    w_up  : (D, 2D)   up weight        (torch .weight.T, bias-free)
    returns (B, 1 + H*W/4, 2D)
    """
    B, L, D = x.shape
    H = W = hw
    assert L == 1 + H * W, "input feature has wrong size"
    assert H % 2 == 0 and W % 2 == 0, f"x size ({H}*{W}) are not even."

    tokens = x[:, 0, :]                                          # (B, D)

    # 2x2 space-to-depth, matching the torch cat order [x0, x1, x2, x3]:
    #   chunk j of the 4D channels corresponds to (col_parity, row_parity)
    #   with j = col_parity * 2 + row_parity.
    patches = x[:, 1:, :].reshape(B, H // 2, 2, W // 2, 2, D)    # (B,Hh,r,Wh,c,D)
    patches = patches.transpose(0, 1, 3, 4, 2, 5)                # (B,Hh,Wh,c,r,D)
    L4 = (H // 2) * (W // 2)
    M = B * L4
    patches = patches.reshape(M, 4 * D)                          # batch folded into M

    tm = _pick_m_tile(M)
    grid = (M // tm,)

    kernel = partial(_patch_merge_kernel, eps=eps)
    out_p, out_t = pl.pallas_call(
        kernel,
        out_shape=(
            jax.ShapeDtypeStruct((M, 2 * D), x.dtype),
            jax.ShapeDtypeStruct((B, 2 * D), x.dtype),
        ),
        grid=grid,
        in_specs=[
            pl.BlockSpec((tm, 4 * D), lambda i: (i, 0)),
            pl.BlockSpec((B, D), lambda i: (0, 0)),
            pl.BlockSpec((1, 4 * D), lambda i: (0, 0)),
            pl.BlockSpec((1, 4 * D), lambda i: (0, 0)),
            pl.BlockSpec((4 * D, 2 * D), lambda i: (0, 0)),
            pl.BlockSpec((D, 2 * D), lambda i: (0, 0)),
        ],
        out_specs=(
            pl.BlockSpec((tm, 2 * D), lambda i: (i, 0)),
            pl.BlockSpec((B, 2 * D), lambda i: (0, 0)),
        ),
        # "arbitrary": the token output block is revisited across the M axis.
        compiler_params=pltpu.CompilerParams(
            dimension_semantics=("arbitrary",)),
    )(
        patches,
        tokens,
        gamma.reshape(1, 4 * D),
        beta.reshape(1, 4 * D),
        w_red.astype(matmul_dtype),
        w_up.astype(matmul_dtype),
    )

    merged = out_p.reshape(B, L4, 2 * D)
    return jnp.concatenate([out_t[:, None, :], merged], axis=1)


def patch_merging_pallas(xs, params, input_resolution, *, eps=1e-5):
    """Mirrors PatchMerging.forward: list in, list out."""
    outs = []
    for x, (gamma, beta, w_red, w_up), hw in zip(xs, params, input_resolution):
        outs.append(
            patch_merging_scale_pallas(x, gamma, beta, w_red, w_up,
                                       hw=hw, eps=eps))
    return outs


def _reference_scale(x, gamma, beta, w_red, w_up, hw, eps=1e-5):
    """Pure-JAX f32 reference mirroring the PyTorch forward for one scale."""
    B, L, D = x.shape
    tokens = x[:, :1, :]
    tmp = x[:, 1:, :].reshape(B, hw, hw, D)
    x0 = tmp[:, 0::2, 0::2, :]
    x1 = tmp[:, 1::2, 0::2, :]
    x2 = tmp[:, 0::2, 1::2, :]
    x3 = tmp[:, 1::2, 1::2, :]
    tmp = jnp.concatenate([x0, x1, x2, x3], -1).reshape(B, -1, 4 * D)
    mu = tmp.mean(-1, keepdims=True)
    var = ((tmp - mu) ** 2).mean(-1, keepdims=True)
    tmp = (tmp - mu) / jnp.sqrt(var + eps) * gamma + beta
    tmp = tmp @ w_red
    tok = tokens @ w_up
    return jnp.concatenate([tok, tmp], axis=1)


if __name__ == "__main__":
    # Small shapes consistent with the module: two scales, batch=2,
    # resolutions (16, 8), channels dim=(64, 128) (each scale has a class token).
    B = 2
    input_resolution = (16, 8)
    dims = (64, 128)
    eps = 1e-5

    key = jax.random.PRNGKey(0)
    xs, params = [], []
    for hw, d in zip(input_resolution, dims):
        key, kx, kg, kb, kr, ku = jax.random.split(key, 6)
        L = 1 + hw * hw
        xs.append(jax.random.normal(kx, (B, L, d), dtype=jnp.float32))
        gamma = 1.0 + 0.1 * jax.random.normal(kg, (4 * d,), dtype=jnp.float32)
        beta = 0.1 * jax.random.normal(kb, (4 * d,), dtype=jnp.float32)
        w_red = 0.05 * jax.random.normal(kr, (4 * d, 2 * d), dtype=jnp.float32)
        w_up = 0.05 * jax.random.normal(ku, (d, 2 * d), dtype=jnp.float32)
        params.append((gamma, beta, w_red, w_up))

    outs = patch_merging_pallas(xs, params, input_resolution, eps=eps)
    outs = [jax.block_until_ready(o) for o in outs]

    for out, x, (gamma, beta, w_red, w_up), hw, d in zip(
            outs, xs, params, input_resolution, dims):
        ref = _reference_scale(x, gamma, beta, w_red, w_up, hw, eps)
        expected_shape = (B, 1 + (hw // 2) * (hw // 2), 2 * d)
        assert out.shape == expected_shape, (out.shape, expected_shape)
        # bf16 MXU operands with f32 accumulation -> small matmul rounding
        # error vs. the pure-f32 reference.
        max_err = float(jnp.max(jnp.abs(out - ref)))
        assert jnp.allclose(out, ref, atol=5e-2, rtol=5e-2), f"max err {max_err}"

    print("KERNEL_OK")
</pallas_src>

<mosaic_0001>
module attributes {stable_mosaic.version = 11 : i64} {
  func.func @_patch_merge_kernel(%arg0: i32, %arg1: memref<128x256xf32, #tpu.memory_space<vmem>>, %arg2: memref<2x64xf32, #tpu.memory_space<vmem>>, %arg3: memref<1x256xf32, #tpu.memory_space<vmem>>, %arg4: memref<1x256xf32, #tpu.memory_space<vmem>>, %arg5: memref<256x128xbf16, #tpu.memory_space<vmem>>, %arg6: memref<64x128xbf16, #tpu.memory_space<vmem>>, %arg7: memref<128x128xf32, #tpu.memory_space<vmem>>, %arg8: memref<2x128xf32, #tpu.memory_space<vmem>>) attributes {dimension_semantics = [#tpu.dimension_semantics<arbitrary>], iteration_bounds = array<i64: 1>, scalar_prefetch = 0 : i64, scratch_operands = 0 : i64, tpu.core_type = #tpu.core_type<tc>, window_params = [{transform_indices = @transform_0, window_bounds = array<i64: 128, 256>}, {pipeline_mode = #tpu.pipeline_mode<synchronous>, transform_indices = @transform_1, window_bounds = array<i64: 2, 64>}, {pipeline_mode = #tpu.pipeline_mode<synchronous>, transform_indices = @transform_2, window_bounds = array<i64: 1, 256>}, {pipeline_mode = #tpu.pipeline_mode<synchronous>, transform_indices = @transform_3, window_bounds = array<i64: 1, 256>}, {pipeline_mode = #tpu.pipeline_mode<synchronous>, transform_indices = @transform_4, window_bounds = array<i64: 256, 128>}, {pipeline_mode = #tpu.pipeline_mode<synchronous>, transform_indices = @transform_5, window_bounds = array<i64: 64, 128>}, {transform_indices = @transform_6, window_bounds = array<i64: 128, 128>}, {pipeline_mode = #tpu.pipeline_mode<synchronous>, transform_indices = @transform_7, window_bounds = array<i64: 2, 128>}]} {
    %c0 = arith.constant 0 : index
    %c0_0 = arith.constant 0 : index
    %0 = vector.load %arg1[%c0, %c0_0] : memref<128x256xf32, #tpu.memory_space<vmem>>, vector<128x256xf32>
    %cst = arith.constant dense<0.000000e+00> : vector<128xf32>
    %1 = vector.multi_reduction <add>, %0, %cst [1] : vector<128x256xf32> to vector<128xf32>
    %2 = vector.shape_cast %1 : vector<128xf32> to vector<128x1xf32>
    %cst_1 = arith.constant 2.560000e+02 : f32
    %3 = vector.broadcast %cst_1 : f32 to vector<128x1xf32>
    %4 = arith.divf %2, %3 : vector<128x1xf32>
    %5 = vector.broadcast %4 : vector<128x1xf32> to vector<128x256xf32>
    %6 = arith.subf %0, %5 : vector<128x256xf32>
    %7 = arith.mulf %6, %6 : vector<128x256xf32>
    %cst_2 = arith.constant dense<0.000000e+00> : vector<128xf32>
    %8 = vector.multi_reduction <add>, %7, %cst_2 [1] : vector<128x256xf32> to vector<128xf32>
    %9 = vector.shape_cast %8 : vector<128xf32> to vector<128x1xf32>
    %cst_3 = arith.constant 2.560000e+02 : f32
    %10 = vector.broadcast %cst_3 : f32 to vector<128x1xf32>
    %11 = arith.divf %9, %10 : vector<128x1xf32>
    %cst_4 = arith.constant 9.99999974E-6 : f32
    %12 = vector.broadcast %cst_4 : f32 to vector<128x1xf32>
    %13 = arith.addf %11, %12 : vector<128x1xf32>
    %14 = math.rsqrt %13 : vector<128x1xf32>
    %15 = vector.broadcast %14 : vector<128x1xf32> to vector<128x256xf32>
    %16 = arith.mulf %6, %15 : vector<128x256xf32>
    %c0_5 = arith.constant 0 : index
    %c0_6 = arith.constant 0 : index
    %17 = vector.load %arg3[%c0_5, %c0_6] : memref<1x256xf32, #tpu.memory_space<vmem>>, vector<1x256xf32>
    %18 = vector.broadcast %17 : vector<1x256xf32> to vector<128x256xf32>
    %19 = arith.mulf %16, %18 : vector<128x256xf32>
    %c0_7 = arith.constant 0 : index
    %c0_8 = arith.constant 0 : index
    %20 = vector.load %arg4[%c0_7, %c0_8] : memref<1x256xf32, #tpu.memory_space<vmem>>, vector<1x256xf32>
    %21 = vector.broadcast %20 : vector<1x256xf32> to vector<128x256xf32>
    %22 = arith.addf %19, %21 : vector<128x256xf32>
    %23 = arith.truncf %22 : vector<128x256xf32> to vector<128x256xbf16>
    %c0_9 = arith.constant 0 : index
    %c0_10 = arith.constant 0 : index
    %24 = vector.load %arg5[%c0_9, %c0_10] : memref<256x128xbf16, #tpu.memory_space<vmem>>, vector<256x128xbf16>
    %cst_11 = arith.constant dense<0.000000e+00> : vector<128x128xf32>
    %25 = tpu.matmul %23, %24, %cst_11 {dimension_numbers = #tpu.dot_dimension_numbers<[1], [0], [0], [1], [0, 0, 1, 1], [], []>} : vector<128x256xbf16>, vector<256x128xbf16>, vector<128x128xf32> -> vector<128x128xf32>
    %c0_12 = arith.constant 0 : index
    %c0_13 = arith.constant 0 : index
    %26 = vector.load %arg7[%c0_12, %c0_13] : memref<128x128xf32, #tpu.memory_space<vmem>>, vector<128x128xf32>
    tpu.vector_store %arg7[%c0_12, %c0_13], %25 {strides = array<i32>} : memref<128x128xf32, #tpu.memory_space<vmem>>, vector<128x128xf32>,
    %c0_i32 = arith.constant 0 : i32
    %27 = arith.cmpi eq, %arg0, %c0_i32 : i32
    %28 = arith.extui %27 : i1 to i32
    %c0_i32_14 = arith.constant 0 : i32
    %29 = arith.cmpi ne, %28, %c0_i32_14 : i32
    scf.if %29 {
      %c0_15 = arith.constant 0 : index
      %c0_16 = arith.constant 0 : index
      %30 = vector.load %arg2[%c0_15, %c0_16] : memref<2x64xf32, #tpu.memory_space<vmem>>, vector<2x64xf32>
      %31 = arith.truncf %30 : vector<2x64xf32> to vector<2x64xbf16>
      %c0_17 = arith.constant 0 : index
      %c0_18 = arith.constant 0 : index
      %32 = vector.load %arg6[%c0_17, %c0_18] : memref<64x128xbf16, #tpu.memory_space<vmem>>, vector<64x128xbf16>
      %cst_19 = arith.constant dense<0.000000e+00> : vector<2x128xf32>
      %33 = tpu.matmul %31, %32, %cst_19 {dimension_numbers = #tpu.dot_dimension_numbers<[1], [0], [0], [1], [0, 0, 1, 1], [], []>} : vector<2x64xbf16>, vector<64x128xbf16>, vector<2x128xf32> -> vector<2x128xf32>
      %c0_20 = arith.constant 0 : index
      %c0_21 = arith.constant 0 : index
      %34 = vector.load %arg8[%c0_20, %c0_21] : memref<2x128xf32, #tpu.memory_space<vmem>>, vector<2x128xf32>
      tpu.vector_store %arg8[%c0_20, %c0_21], %33 {strides = array<i32>} : memref<2x128xf32, #tpu.memory_space<vmem>>, vector<2x128xf32>,
    } else {
    }
    return
  }
  func.func @transform_0(%arg0: i32) -> (i32, i32) {
    %c0_i32 = arith.constant 0 : i32
    %c0_i32_0 = arith.constant 0 : i32
    return %arg0, %c0_i32 : i32, i32
  }
  func.func @transform_1(%arg0: i32) -> (i32, i32) {
    %c0_i32 = arith.constant 0 : i32
    %c0_i32_0 = arith.constant 0 : i32
    %c0_i32_1 = arith.constant 0 : i32
    return %c0_i32, %c0_i32_0 : i32, i32
  }
  func.func @transform_2(%arg0: i32) -> (i32, i32) {
    %c0_i32 = arith.constant 0 : i32
    %c0_i32_0 = arith.constant 0 : i32
    %c0_i32_1 = arith.constant 0 : i32
    return %c0_i32, %c0_i32_0 : i32, i32
  }
  func.func @transform_3(%arg0: i32) -> (i32, i32) {
    %c0_i32 = arith.constant 0 : i32
    %c0_i32_0 = arith.constant 0 : i32
    %c0_i32_1 = arith.constant 0 : i32
    return %c0_i32, %c0_i32_0 : i32, i32
  }
  func.func @transform_4(%arg0: i32) -> (i32, i32) {
    %c0_i32 = arith.constant 0 : i32
    %c0_i32_0 = arith.constant 0 : i32
    %c0_i32_1 = arith.constant 0 : i32
    return %c0_i32, %c0_i32_0 : i32, i32
  }
  func.func @transform_5(%arg0: i32) -> (i32, i32) {
    %c0_i32 = arith.constant 0 : i32
    %c0_i32_0 = arith.constant 0 : i32
    %c0_i32_1 = arith.constant 0 : i32
    return %c0_i32, %c0_i32_0 : i32, i32
  }
  func.func @transform_6(%arg0: i32) -> (i32, i32) {
    %c0_i32 = arith.constant 0 : i32
    %c0_i32_0 = arith.constant 0 : i32
    return %arg0, %c0_i32 : i32, i32
  }
  func.func @transform_7(%arg0: i32) -> (i32, i32) {
    %c0_i32 = arith.constant 0 : i32
    %c0_i32_0 = arith.constant 0 : i32
    %c0_i32_1 = arith.constant 0 : i32
    return %c0_i32, %c0_i32_0 : i32, i32
  }
}

</mosaic_0001>

<bundles_post_ra>
// kernel: tpu_custom_call.1
= control target key start
LH: loop header
LB: loop body
LE: loop exit
PB: predicated region body
PF: predicated region fallthrough
CT: control target
= control target key end

     0   :  { %13 = vsyncpa [#allocation3], 0  ;;  %s1619_s0 = inlined_call_operand.hbm [shape: f32[128,256], index: 0, kind: input, shape index: {}]   ;;  %s1620_s1 = inlined_call_operand.vmem [shape: f32[2,64], index: 1, kind: input, shape index: {}]   ;;  %s1621_s2 = inlined_call_operand.vmem [shape: f32[1,256], index: 2, kind: input, shape index: {}]   ;;  %s1622_s3 = inlined_call_operand.vmem [shape: f32[1,256], index: 3, kind: input, shape index: {}]   ;;  %s1623_s4 = inlined_call_operand.hbm [shape: bf16[256,128], index: 4, kind: input, shape index: {}]   ;;  %s1624_s5 = inlined_call_operand.hbm [shape: bf16[64,128], index: 5, kind: input, shape index: {}]   ;;  %s1625_s6 = inlined_call_operand.hbm [shape: f32[128,128], index: 6, kind: output, shape index: {0}]   ;;  %s1626_s7 = inlined_call_operand.hbm [shape: f32[2,128], index: 7, kind: output, shape index: {1}]  }
   0x1   :  { %14 = vsyncpa [#allocation6], 0 }
   0x2   :  { %15 = vsyncpa [#allocation4], 0 }
   0x3   :  { %16 = vsyncpa [#allocation10], 0  ;;  %s1119_s24 = smov [#allocation5]   ;;  %s1001_s28 = scalar_lea.hbm %s1623_s4, 2048 }
   0x4   :  { %s40_s25 = sshll.u32 %s1119_s24, 4  ;;  %p1002_p0 = scmp.ne.s32.totalorder %s1623_s4, %s1001_s28  ;;  %s41_s25 = int_to_ptr.vmem [resolvable:$true] %s40_s25 }
   0x5   :  { %p1005_p1 = scmp.lt.u32.totalorder %s1001_s28, %s1623_s4 }
   0x7   :  { %p1007_p2 = pnand %p1005_p1, %p1002_p0 }
   0x9   :  { %1010 = shalt.err (!%p1007_p2)
}
   0xa   :  { %s1011_s10 = scalar_lea.vmem %s41_s25, 2048  ;;  %p1016_p4 = scmp.lt.s32.totalorder %s41_s25, %s41_s25 }
   0xb   :  { %p1012_p3 = scmp.ne.s32.totalorder %s41_s25, %s1011_s10  ;;  %p1017_p5 = scmp.lt.s32.totalorder %s1011_s10, %s1011_s10 }
   0xd   :  { %p1018_p6 = por %p1017_p5, %p1016_p4 }
   0xf   :  { %p1019_p7 = pnand %p1018_p6, %p1012_p3 }
  0x11   :  { %1022 = shalt.err (!%p1019_p7)
}
  0x12   :  { %s1120_s11 = smov 64   ;;  %s1121_s12 = smov 4  }
  0x13   :  { %46 = dma.hbm_to_vmem [thread:$0]  %s1623_s4, 2048, %s41_s25, [#allocation6], %s1120_s11, %s1120_s11, %s1121_s12  }
  0x14   :  { %s1122_s15 = smov [#allocation2]   ;;  %s1023_s19 = scalar_lea.hbm %s1619_s0, 4096 }
  0x15   :  { %s22_s16 = sshll.u32 %s1122_s15, 4  ;;  %p1024_p8 = scmp.ne.s32.totalorder %s1619_s0, %s1023_s19  ;;  %s23_s16 = int_to_ptr.vmem [resolvable:$true] %s22_s16 }
  0x16   :  { %p1027_p9 = scmp.lt.u32.totalorder %s1023_s19, %s1619_s0 }
  0x18   :  { %p1029_p10 = pnand %p1027_p9, %p1024_p8 }
  0x1a   :  { %1032 = shalt.err (!%p1029_p10)
}
  0x1b   :  { %s1033_s24 = scalar_lea.vmem %s23_s16, 4096  ;;  %p1038_p12 = scmp.lt.s32.totalorder %s23_s16, %s23_s16 }
  0x1c   :  { %p1034_p11 = scmp.ne.s32.totalorder %s23_s16, %s1033_s24  ;;  %p1039_p13 = scmp.lt.s32.totalorder %s1033_s24, %s1033_s24 }
  0x1e   :  { %p1040_p0 = por %p1039_p13, %p1038_p12 }
  0x20   :  { %p1041_p1 = pnand %p1040_p0, %p1034_p11 }
  0x22   :  { %1044 = shalt.err (!%p1041_p1)
}
  0x23   :  { %s1123_s4 = smov 256   ;;  %s1124_s25 = smov 16  }
  0x24   :  { %28 = dma.hbm_to_vmem [thread:$0]  %s1619_s0, 4096, %s23_s16, [#allocation3], %s1123_s4, %s1123_s4, %s1124_s25  }
  0x25   :  { %s1125_s28 = smov [#allocation7]   ;;  %s1045_s9 = scalar_lea.hbm %s1624_s5, 512 }
  0x26   :  { %s52_s29 = sshll.u32 %s1125_s28, 4  ;;  %p1046_p2 = scmp.ne.s32.totalorder %s1624_s5, %s1045_s9  ;;  %s53_s29 = int_to_ptr.vmem [resolvable:$true] %s52_s29 }
  0x27   :  { %p1049_p3 = scmp.lt.u32.totalorder %s1045_s9, %s1624_s5 }
  0x29   :  { %p1051_p4 = pnand %p1049_p3, %p1046_p2 }
  0x2b   :  { %1054 = shalt.err (!%p1051_p4)
}
  0x2c   :  { %s1055_s17 = scalar_lea.vmem %s53_s29, 512  ;;  %p1060_p6 = scmp.lt.s32.totalorder %s53_s29, %s53_s29 }
  0x2d   :  { %p1056_p5 = scmp.ne.s32.totalorder %s53_s29, %s1055_s17  ;;  %p1061_p7 = scmp.lt.s32.totalorder %s1055_s17, %s1055_s17 }
  0x2f   :  { %p1062_p8 = por %p1061_p7, %p1060_p6 }
  0x31   :  { %p1063_p9 = pnand %p1062_p8, %p1056_p5 }
  0x33   :  { %1066 = shalt.err (!%p1063_p9)
}
  0x34   :  { %58 = dma.hbm_to_vmem [thread:$0]  %s1624_s5, 512, %s53_s29, [#allocation6], %s1120_s11, %s1120_s11, %s1121_s12  }
  0x35   :  { %1111 = dma.done.wait [#allocation3], 4096  }
  0x36   :  { %1112 = vsyncadd [#allocation3], 4294963200 }
  0x37   :  { %1113 = dma.done.wait [#allocation6], 2560  }
  0x38   :  { %1114 = vsyncadd [#allocation6], 4294964736  ;;  %v1214_v0 = vld [vmem:[#allocation2] sm:$0xff]  ;;  %v1216_v1 = vld [vmem:[#allocation2 + $0x8] sm:$0xff]  ;;  %vm1127_vm0 = vmmov 0   ;;  %vm741_vm1 = vcmask 523264  }
  0x39   :  { %v1218_v2 = vld [vmem:[#allocation2 + $0x20] sm:$0xff]  ;;  %v101_v3 = vadd.f32 %v1216_v1, %v1214_v0  ;;  %v1222_v4 = vld [vmem:[#allocation2 + $0x28] sm:$0xff]  ;;  %v1224_v5 = vld [vmem:[#allocation2 + $0x10] sm:$0xff]  ;;  %s1129_s20 = smov [#allocation8]  }
  0x3a   :  { %v1226_v6 = vld [vmem:[#allocation2 + $0x18] sm:$0xff]  ;;  %v107_v7 = vadd.f32 %v1222_v4, %v1218_v2  ;;  %v1230_v8 = vld [vmem:[#allocation2 + $0x30] sm:$0xff]  ;;  %v1238_v12 = vld [vmem:[#allocation2 + $0xa0] sm:$0xff]  ;;  %s791_s21 = sshll.u32 %s1129_s20, 4  ;;  %s1588_s21 = int_to_ptr.vmem [resolvable:$true] %s791_s21 }
  0x3b   :  { %v1232_v9 = vld [vmem:[#allocation2 + $0x38] sm:$0xff]  ;;  %102 = vadd.xlane.f32.xlu0 %v101_v3  ;;  %v104_v10 = vadd.f32 %v1226_v6, %v1224_v5  ;;  %v1240_v13 = vld [vmem:[#allocation2 + $0xa8] sm:$0xff]  ;;  %v1242_v14 = vld [vmem:[#allocation2 + $0xb0] sm:$0xff] }
  0x3c   :  { %108 = vadd.xlane.f32.xlu1 %v107_v7  ;;  %v110_v11 = vadd.f32 %v1232_v9, %v1230_v8  ;;  %v1244_v15 = vld [vmem:[#allocation2 + $0xb8] sm:$0xff]  ;;  %v131_v16 = vadd.f32 %v1240_v13, %v1238_v12  ;;  %v1250_v18 = vld [vmem:[#allocation2 + $0x40] sm:$0xff]  ;;  %v1252_v19 = vld [vmem:[#allocation2 + $0x48] sm:$0xff] }
  0x3d   :  { %v134_v17 = vadd.f32 %v1244_v15, %v1242_v14  ;;  %v1254_v20 = vld [vmem:[#allocation2 + $0x50] sm:$0xff]  ;;  %v1256_v21 = vld [vmem:[#allocation2 + $0x58] sm:$0xff]  ;;  %v1258_v22 = vld [vmem:[#allocation2 + $0xc0] sm:$0xff]  ;;  %v113_v24 = vadd.f32 %v1252_v19, %v1250_v18 }
  0x3e   :  { %v1260_v23 = vld [vmem:[#allocation2 + $0xc8] sm:$0xff]  ;;  %v1264_v25 = vld [vmem:[#allocation2 + $0xd0] sm:$0xff]  ;;  %v1266_v26 = vld [vmem:[#allocation2 + $0xd8] sm:$0xff]  ;;  %v116_v27 = vadd.f32 %v1256_v21, %v1254_v20 }
  0x3f   :  { %105 = vadd.xlane.f32.xlu0 %v104_v10  ;;  %v1270_v28 = vld [vmem:[#allocation2 + $0x60] sm:$0xff]  ;;  %v1272_v29 = vld [vmem:[#allocation2 + $0x68] sm:$0xff]  ;;  %v137_v30 = vadd.f32 %v1260_v23, %v1258_v22  ;;  %v1276_v31 = vld [vmem:[#allocation2 + $0x70] sm:$0xff]  ;;  %v140_v33 = vadd.f32 %v1266_v26, %v1264_v25 }
  0x40   :  { %111 = vadd.xlane.f32.xlu1 %v110_v11  ;;  %v1278_v32 = vld [vmem:[#allocation2 + $0x78] sm:$0xff]  ;;  %v1282_v34 = vld [vmem:[#allocation2 + $0xe0] sm:$0xff]  ;;  %v1284_v35 = vld [vmem:[#allocation2 + $0xe8] sm:$0xff]  ;;  %v119_v36 = vadd.f32 %v1272_v29, %v1270_v28 }
  0x41   :  { %v1288_v37 = vld [vmem:[#allocation2 + $0xf0] sm:$0xff]  ;;  %v1290_v38 = vld [vmem:[#allocation2 + $0xf8] sm:$0xff]  ;;  %v122_v39 = vadd.f32 %v1278_v32, %v1276_v31  ;;  %v143_v40 = vadd.f32 %v1284_v35, %v1282_v34  ;;  %v1298_v42 = vld [vmem:[#allocation2 + $0x80] sm:$0xff] }
  0x42   :  { %v146_v41 = vadd.f32 %v1290_v38, %v1288_v37  ;;  %v1300_v43 = vld [vmem:[#allocation2 + $0x88] sm:$0xff]  ;;  %v1302_v44 = vld [vmem:[#allocation2 + $0x90] sm:$0xff]  ;;  %v1304_v45 = vld [vmem:[#allocation2 + $0x98] sm:$0xff] }
  0x43   :  { %132 = vadd.xlane.f32.xlu0 %v131_v16  ;;  %v125_v46 = vadd.f32 %v1300_v43, %v1298_v42  ;;  %v128_v47 = vadd.f32 %v1304_v45, %v1302_v44  ;;  %v949_v48 = vld [vmem:[#allocation5 + $0x40] sm:$0xff]  }
  0x44   :  { %135 = vadd.xlane.f32.xlu1 %v134_v17  ;;  %v950_v49 = vld [vmem:[#allocation5] sm:$0xff]   ;;  %839 = vmatprep.subr.bf16.mxu0 %v949_v48 }
  0x45   :  { %920 = vmatprep.subr.bf16.mxu1 %v949_v48  ;;  %840 = vmatpush3.bf16.msra.mxu0 %v950_v49 }
  0x46   :  { %928 = vmatpush3.bf16.msra.mxu1 %v950_v49 }
  0x47   :  { %114 = vadd.xlane.f32.xlu0 %v113_v24 }
  0x48   :  { %117 = vadd.xlane.f32.xlu1 %v116_v27 }
  0x4b   :  { %138 = vadd.xlane.f32.xlu0 %v137_v30 }
  0x4c   :  { %141 = vadd.xlane.f32.xlu1 %v140_v33 }
  0x4f   :  { %120 = vadd.xlane.f32.xlu0 %v119_v36 }
  0x50   :  { %123 = vadd.xlane.f32.xlu1 %v122_v39 }
  0x53   :  { %144 = vadd.xlane.f32.xlu0 %v143_v40 }
  0x54   :  { %147 = vadd.xlane.f32.xlu1 %v146_v41 }
  0x57   :  { %126 = vadd.xlane.f32.xlu0 %v125_v46 }
  0x58   :  { %129 = vadd.xlane.f32.xlu1 %v128_v47 }
  0xc8   :  { %v103_v50 = vpop.xlane.xlu0 %102 }
  0xc9   :  { %v150_v51 = vmul.f32 0.00390625, %v103_v50  ;;  %v109_v52 = vpop.xlane.xlu1 %108 }
  0xca   :  { %v152_v53 = vmul.f32 0.00390625, %v109_v52 }
  0xcb   :  { %v1311_v54 = vsub.f32 %v1214_v0, %v150_v51  ;;  %v1314_v55 = vsub.f32 %v1216_v1, %v150_v51 }
  0xcc   :  { %v1317_v56 = vsub.f32 %v1218_v2, %v152_v53  ;;  %v1320_v57 = vsub.f32 %v1222_v4, %v152_v53  ;;  %v106_v58 = vpop.xlane.xlu0 %105 }
  0xcd   :  { %v151_v59 = vmul.f32 0.00390625, %v106_v58  ;;  %v112_v60 = vpop.xlane.xlu1 %111  ;;  %v198_v61 = vmul.f32 %v1311_v54, %v1311_v54  ;;  %v199_v62 = vmul.f32 %v1314_v55, %v1314_v55 }
  0xce   :  { %v153_v63 = vmul.f32 0.00390625, %v112_v60  ;;  %v202_v0 = vmul.f32 %v1317_v56, %v1317_v56  ;;  %v203_v1 = vmul.f32 %v1320_v57, %v1320_v57 }
  0xcf   :  { %v1331_v2 = vsub.f32 %v1224_v5, %v151_v59  ;;  %v1334_v3 = vsub.f32 %v1226_v6, %v151_v59  ;;  %v230_v4 = vadd.f32 %v199_v62, %v198_v61 }
  0xd0   :  { %v1337_v7 = vsub.f32 %v1230_v8, %v153_v63  ;;  %v1340_v10 = vsub.f32 %v1232_v9, %v153_v63  ;;  %v133_v11 = vpop.xlane.xlu0 %132  ;;  %v236_v24 = vadd.f32 %v203_v1, %v202_v0 }
  0xd1   :  { %v160_v16 = vmul.f32 0.00390625, %v133_v11  ;;  %231 = vadd.xlane.f32.xlu0 %v230_v4  ;;  %v136_v17 = vpop.xlane.xlu1 %135  ;;  %v200_v27 = vmul.f32 %v1331_v2, %v1331_v2  ;;  %v201_v5 = vmul.f32 %v1334_v3, %v1334_v3 }
  0xd2   :  { %v161_v6 = vmul.f32 0.00390625, %v136_v17  ;;  %v204_v30 = vmul.f32 %v1337_v7, %v1337_v7  ;;  %v205_v8 = vmul.f32 %v1340_v10, %v1340_v10 }
  0xd3   :  { %v1351_v9 = vsub.f32 %v1238_v12, %v160_v16  ;;  %v1354_v33 = vsub.f32 %v1240_v13, %v160_v16  ;;  %v233_v36 = vadd.f32 %v201_v5, %v200_v27 }
  0xd4   :  { %v1357_v39 = vsub.f32 %v1242_v14, %v161_v6  ;;  %v1360_v40 = vsub.f32 %v1244_v15, %v161_v6  ;;  %v115_v41 = vpop.xlane.xlu0 %114  ;;  %v239_v48 = vadd.f32 %v205_v8, %v204_v30  ;;  %v951_v6 = vld [vmem:[#allocation5 + $0x48] sm:$0xff]  }
  0xd5   :  { %v154_v46 = vmul.f32 0.00390625, %v115_v41  ;;  %237 = vadd.xlane.f32.xlu0 %v236_v24  ;;  %234 = vadd.xlane.f32.xlu1 %v233_v36  ;;  %v118_v47 = vpop.xlane.xlu1 %117  ;;  %v218_v12 = vmul.f32 %v1351_v9, %v1351_v9  ;;  %v219_v13 = vmul.f32 %v1354_v33, %v1354_v33  ;;  %v952_v8 = vld [vmem:[#allocation5 + $0x8] sm:$0xff]  }
  0xd6   :  { %v155_v49 = vmul.f32 0.00390625, %v118_v47  ;;  %v220_v14 = vmul.f32 %v1357_v39, %v1357_v39  ;;  %v221_v15 = vmul.f32 %v1360_v40, %v1360_v40  ;;  %841 = vmatprep.subr.bf16.mxu0 %v951_v6  ;;  %921 = vmatprep.subr.bf16.mxu1 %v951_v6 }
  0xd7   :  { %v1371_v50 = vsub.f32 %v1250_v18, %v154_v46  ;;  %v1374_v51 = vsub.f32 %v1252_v19, %v154_v46  ;;  %v260_v52 = vadd.f32 %v219_v13, %v218_v12  ;;  %842 = vmatpush3.bf16.msra.mxu0 %v952_v8  ;;  %929 = vmatpush3.bf16.msra.mxu1 %v952_v8 }
  0xd8   :  { %v1377_v53 = vsub.f32 %v1254_v20, %v155_v49  ;;  %v1380_v58 = vsub.f32 %v1256_v21, %v155_v49  ;;  %v139_v59 = vpop.xlane.xlu0 %138  ;;  %v263_v62 = vadd.f32 %v221_v15, %v220_v14 }
  0xd9   :  { %v162_v60 = vmul.f32 0.00390625, %v139_v59  ;;  %240 = vadd.xlane.f32.xlu1 %v239_v48  ;;  %261 = vadd.xlane.f32.xlu0 %v260_v52  ;;  %v142_v61 = vpop.xlane.xlu1 %141  ;;  %v206_v18 = vmul.f32 %v1371_v50, %v1371_v50  ;;  %v207_v19 = vmul.f32 %v1374_v51, %v1374_v51  ;;  %v953_v52 = vld [vmem:[#allocation5 + $0x50] sm:$0xff]  }
  0xda   :  { %v163_v63 = vmul.f32 0.00390625, %v142_v61  ;;  %v208_v20 = vmul.f32 %v1377_v53, %v1377_v53  ;;  %v209_v21 = vmul.f32 %v1380_v58, %v1380_v58  ;;  %843 = vmatprep.subr.bf16.mxu0 %v953_v52  ;;  %922 = vmatprep.subr.bf16.mxu1 %v953_v52 }
  0xdb   :  { %v1391_v0 = vsub.f32 %v1258_v22, %v162_v60  ;;  %v1394_v1 = vsub.f32 %v1260_v23, %v162_v60  ;;  %v242_v4 = vadd.f32 %v207_v19, %v206_v18 }
  0xdc   :  { %v1397_v11 = vsub.f32 %v1264_v25, %v163_v63  ;;  %v1400_v16 = vsub.f32 %v1266_v26, %v163_v63  ;;  %v121_v17 = vpop.xlane.xlu0 %120  ;;  %v245_v5 = vadd.f32 %v209_v21, %v208_v20 }
  0xdd   :  { %v156_v24 = vmul.f32 0.00390625, %v121_v17  ;;  %264 = vadd.xlane.f32.xlu1 %v263_v62  ;;  %243 = vadd.xlane.f32.xlu0 %v242_v4  ;;  %v124_v27 = vpop.xlane.xlu1 %123  ;;  %v222_v22 = vmul.f32 %v1391_v0, %v1391_v0  ;;  %v223_v23 = vmul.f32 %v1394_v1, %v1394_v1  ;;  %v954_v62 = vld [vmem:[#allocation5 + $0x10] sm:$0xff]  }
  0xde   :  { %v157_v30 = vmul.f32 0.00390625, %v124_v27  ;;  %v224_v25 = vmul.f32 %v1397_v11, %v1397_v11  ;;  %v225_v26 = vmul.f32 %v1400_v16, %v1400_v16  ;;  %844 = vmatpush3.bf16.msra.mxu0 %v954_v62  ;;  %930 = vmatpush3.bf16.msra.mxu1 %v954_v62 }
  0xdf   :  { %v1411_v36 = vsub.f32 %v1270_v28, %v156_v24  ;;  %v1414_v41 = vsub.f32 %v1272_v29, %v156_v24  ;;  %v266_v46 = vadd.f32 %v223_v23, %v222_v22  ;;  %v955_v24 = vld [vmem:[#allocation5 + $0x58] sm:$0xff]  }
  0xe0   :  { %v1417_v47 = vsub.f32 %v1276_v31, %v157_v30  ;;  %v1420_v48 = vsub.f32 %v1278_v32, %v157_v30  ;;  %v145_v12 = vpop.xlane.xlu0 %144  ;;  %v269_v49 = vadd.f32 %v225_v26, %v224_v25  ;;  %v956_v23 = vld [vmem:[#allocation5 + $0x18] sm:$0xff]   ;;  %845 = vmatprep.subr.bf16.mxu0 %v955_v24  ;;  %923 = vmatprep.subr.bf16.mxu1 %v955_v24 }
  0xe1   :  { %v164_v13 = vmul.f32 0.00390625, %v145_v12  ;;  %246 = vadd.xlane.f32.xlu1 %v245_v5  ;;  %267 = vadd.xlane.f32.xlu0 %v266_v46  ;;  %v148_v28 = vpop.xlane.xlu1 %147  ;;  %v210_v29 = vmul.f32 %v1411_v36, %v1411_v36  ;;  %v211_v14 = vmul.f32 %v1414_v41, %v1414_v41  ;;  %v958_v46 = vld [vmem:[#allocation5 + $0x20] sm:$0xff]  }
  0xe2   :  { %v165_v15 = vmul.f32 0.00390625, %v148_v28  ;;  %v212_v31 = vmul.f32 %v1417_v47, %v1417_v47  ;;  %v213_v32 = vmul.f32 %v1420_v48, %v1420_v48  ;;  %846 = vmatpush3.bf16.msra.mxu0 %v956_v23  ;;  %931 = vmatpush3.bf16.msra.mxu1 %v956_v23  ;;  %v960_v28 = vld [vmem:[#allocation5 + $0x28] sm:$0xff]  }
  0xe3   :  { %v1431_v59 = vsub.f32 %v1282_v34, %v164_v13  ;;  %v1434_v60 = vsub.f32 %v1284_v35, %v164_v13  ;;  %v248_v61 = vadd.f32 %v211_v14, %v210_v29  ;;  %v959_v13 = vld [vmem:[#allocation5 + $0x68] sm:$0xff]   ;;  %v962_v29 = vld [vmem:[#allocation5 + $0x30] sm:$0xff]   ;;  %v963_v14 = vld [vmem:[#allocation5 + $0x78] sm:$0xff]  }
  0xe4   :  { %v1437_v18 = vsub.f32 %v1288_v37, %v165_v15  ;;  %v1440_v19 = vsub.f32 %v1290_v38, %v165_v15  ;;  %v127_v63 = vpop.xlane.xlu0 %126  ;;  %v251_v34 = vadd.f32 %v213_v32, %v212_v31  ;;  %v964_v15 = vld [vmem:[#allocation5 + $0x38] sm:$0xff]   ;;  %v1126_v31 = vmov 0.0  }
  0xe5   :  { %v158_v20 = vmul.f32 0.00390625, %v127_v63  ;;  %270 = vadd.xlane.f32.xlu1 %v269_v49  ;;  %249 = vadd.xlane.f32.xlu0 %v248_v61  ;;  %v130_v21 = vpop.xlane.xlu1 %129  ;;  %v226_v35 = vmul.f32 %v1431_v59, %v1431_v59  ;;  %v227_v4 = vmul.f32 %v1434_v60, %v1434_v60  ;;  %v961_v49 = vld [vmem:[#allocation5 + $0x70] sm:$0xff]   ;;  %v360_v61 = vlaneseq }
  0xe6   :  { %v159_v17 = vmul.f32 0.00390625, %v130_v21  ;;  %v228_v37 = vmul.f32 %v1437_v18, %v1437_v18  ;;  %v229_v38 = vmul.f32 %v1440_v19, %v1440_v19 }
  0xe7   :  { %v1451_v27 = vsub.f32 %v1298_v42, %v158_v20  ;;  %v1454_v5 = vsub.f32 %v1300_v43, %v158_v20  ;;  %v272_v22 = vadd.f32 %v227_v4, %v226_v35  ;;  %v361_v35 = vshrl.u32 %v360_v61, 7 }
  0xe8   :  { %v1457_v6 = vsub.f32 %v1302_v44, %v159_v17  ;;  %v1460_v30 = vsub.f32 %v1304_v45, %v159_v17  ;;  %v275_v25 = vadd.f32 %v229_v38, %v228_v37  ;;  %v957_v45 = vld [vmem:[#allocation5 + $0x60] sm:$0xff]  }
  0xe9   :  { %252 = vadd.xlane.f32.xlu1 %v251_v34  ;;  %273 = vadd.xlane.f32.xlu0 %v272_v22  ;;  %v214_v42 = vmul.f32 %v1451_v27, %v1451_v27  ;;  %v215_v43 = vmul.f32 %v1454_v5, %v1454_v5  ;;  %v362_v23 = vsub.s32 0, %v361_v35 }
  0xea   :  { %v216_v26 = vmul.f32 %v1457_v6, %v1457_v6  ;;  %v217_v44 = vmul.f32 %v1460_v30, %v1460_v30  ;;  %847 = vmatprep.subr.bf16.mxu0 %v957_v45  ;;  %924 = vmatprep.subr.bf16.mxu1 %v957_v45 }
  0xeb   :  { %v254_v8 = vadd.f32 %v215_v43, %v214_v42  ;;  %848 = vmatpush3.bf16.msra.mxu0 %v958_v46  ;;  %932 = vmatpush3.bf16.msra.mxu1 %v958_v46 }
  0xec   :  { %v257_v12 = vadd.f32 %v217_v44, %v216_v26  ;;  %849 = vmatprep.subr.bf16.mxu0 %v959_v13  ;;  %925 = vmatprep.subr.bf16.mxu1 %v959_v13  ;;  %v358_v26 = vld [vmem:[%s1621_s2] sm:$0x3] }
  0xed   :  { %276 = vadd.xlane.f32.xlu1 %v275_v25  ;;  %255 = vadd.xlane.f32.xlu0 %v254_v8  ;;  %v366_v25 = vsub.s32 1, %v361_v35  ;;  %v1477_v13 = vrot.slane %v358_v26, %v362_v23 }
  0xef   :  { %850 = vmatpush3.bf16.msra.mxu0 %v960_v28  ;;  %933 = vmatpush3.bf16.msra.mxu1 %v960_v28  ;;  %v1479_v28 = vrot.slane %v358_v26, %v366_v25 }
  0xf0   :  { %851 = vmatprep.subr.bf16.mxu0 %v961_v49  ;;  %926 = vmatprep.subr.bf16.mxu1 %v961_v49 }
  0xf1   :  { %258 = vadd.xlane.f32.xlu1 %v257_v12  ;;  %v402_v12 = vld [vmem:[%s1622_s3] sm:$0x3] }
  0xf2   :  { %v1482_v61 = vrot.slane %v402_v12, %v366_v25 }
  0xf3   :  { %852 = vmatpush3.bf16.msra.mxu0 %v962_v29  ;;  %934 = vmatpush3.bf16.msra.mxu1 %v962_v29 }
  0xf4   :  { %853 = vmatprep.subr.bf16.mxu0 %v963_v14  ;;  %927 = vmatprep.subr.bf16.mxu1 %v963_v14 }
  0xf7   :  { %854 = vmatpush3.bf16.msra.mxu0 %v964_v15  ;;  %935 = vmatpush3.bf16.msra.mxu1 %v964_v15 }
  0xf8   :  { %908 = vmatprep.subr.bf16.mxu1 %v1126_v31 }
 0x15e   :  { %v232_v32 = vpop.xlane.xlu0 %231 }
 0x15f   :  { %v278_v52 = vmul.f32 0.00390625, %v232_v32 }
 0x161   :  { %v294_v62 = vadd.f32 1e-05, %v278_v52 }
 0x162   :  { %v235_v63 = vpop.xlane.xlu1 %234  ;;  %v238_v20 = vpop.xlane.xlu0 %237 }
 0x163   :  { %969 = vrsqrt.f32 %v294_v62  ;;  %v279_v21 = vmul.f32 0.00390625, %v235_v63  ;;  %v280_v34 = vmul.f32 0.00390625, %v238_v20 }
 0x165   :  { %v295_v4 = vadd.f32 1e-05, %v279_v21  ;;  %v296_v17 = vadd.f32 1e-05, %v280_v34  ;;  %v1486_v34 = vrot.slane %v402_v12, %v362_v23 }
 0x166   :  { %v241_v37 = vpop.xlane.xlu1 %240  ;;  %v262_v38 = vpop.xlane.xlu0 %261 }
 0x167   :  { %971 = vrsqrt.f32 %v295_v4  ;;  %v281_v24 = vmul.f32 0.00390625, %v241_v37  ;;  %v288_v22 = vmul.f32 0.00390625, %v262_v38 }
 0x168   :  { %973 = vrsqrt.f32 %v296_v17 }
 0x169   :  { %v297_v42 = vadd.f32 1e-05, %v281_v24  ;;  %v304_v43 = vadd.f32 1e-05, %v288_v22 }
 0x16a   :  { %v265_v44 = vpop.xlane.xlu1 %264  ;;  %v244_v45 = vpop.xlane.xlu0 %243 }
 0x16b   :  { %975 = vrsqrt.f32 %v297_v42  ;;  %v289_v8 = vmul.f32 0.00390625, %v265_v44  ;;  %v282_v46 = vmul.f32 0.00390625, %v244_v45 }
 0x16c   :  { %977 = vrsqrt.f32 %v304_v43 }
 0x16d   :  { %v970_v49 = vpop.eup %969  ;;  %v305_v29 = vadd.f32 1e-05, %v289_v8  ;;  %v298_v14 = vadd.f32 1e-05, %v282_v46 }
 0x16e   :  { %v247_v15 = vpop.xlane.xlu1 %246  ;;  %v268_v32 = vpop.xlane.xlu0 %267  ;;  %v327_v52 = vmul.f32 %v970_v49, %v1314_v55  ;;  %v326_v62 = vmul.f32 %v970_v49, %v1311_v54 }
 0x16f   :  { %979 = vrsqrt.f32 %v305_v29  ;;  %v283_v63 = vmul.f32 0.00390625, %v247_v15  ;;  %v290_v20 = vmul.f32 0.00390625, %v268_v32 }
 0x170   :  { %v371_v21 = vmul.f32 %v1479_v28, %v327_v52  ;;  %v370_v35 = vmul.f32 %v1477_v13, %v326_v62  ;;  %981 = vrsqrt.f32 %v298_v14 }
 0x171   :  { %v972_v4 = vpop.eup %971  ;;  %v299_v17 = vadd.f32 1e-05, %v283_v63  ;;  %v306_v37 = vadd.f32 1e-05, %v290_v20 }
 0x172   :  { %v974_v38 = vpop.eup %973  ;;  %v271_v24 = vpop.xlane.xlu1 %270  ;;  %v329_v22 = vmul.f32 %v972_v4, %v1334_v3  ;;  %v415_v54 = vadd.f32 %v1482_v61, %v371_v21  ;;  %v328_v25 = vmul.f32 %v972_v4, %v1331_v2  ;;  %v414_v45 = vadd.f32 %v1486_v34, %v370_v35 }
 0x173   :  { %v250_v55 = vpop.xlane.xlu0 %249  ;;  %983 = vrsqrt.f32 %v299_v17  ;;  %v291_v42 = vmul.f32 0.00390625, %v271_v24  ;;  %v331_v23 = vmul.f32 %v974_v38, %v1320_v57  ;;  %v330_v49 = vmul.f32 %v974_v38, %v1317_v56 }
 0x174   :  { %v284_v43 = vmul.f32 0.00390625, %v250_v55  ;;  %985 = vrsqrt.f32 %v306_v37  ;;  %v373_v26 = vmul.f32 %v1479_v28, %v329_v22  ;;  %v372_v44 = vmul.f32 %v1477_v13, %v328_v25 }
 0x175   :  { %v976_v8 = vpop.eup %975  ;;  %v307_v46 = vadd.f32 1e-05, %v291_v42  ;;  %v375_v3 = vmul.f32 %v1479_v28, %v331_v23  ;;  %v374_v24 = vmul.f32 %v1477_v13, %v330_v49 }
 0x176   :  { %v300_v12 = vadd.f32 1e-05, %v284_v43  ;;  %v978_v2 = vpop.eup %977  ;;  %v253_v29 = vpop.xlane.xlu1 %252  ;;  %v417_v15 = vadd.f32 %v1482_v61, %v373_v26  ;;  %v416_v57 = vadd.f32 %v1486_v34, %v372_v44  ;;  %v333_v32 = vmul.f32 %v976_v8, %v1340_v10 }
 0x177   :  { %v274_v14 = vpop.xlane.xlu0 %273  ;;  %v332_v52 = vmul.f32 %v976_v8, %v1337_v7  ;;  %987 = vrsqrt.f32 %v307_v46  ;;  %v285_v62 = vmul.f32 0.00390625, %v253_v29  ;;  %v419_v20 = vadd.f32 %v1482_v61, %v375_v3 }
 0x178   :  { %v292_v63 = vmul.f32 0.00390625, %v274_v14  ;;  %989 = vrsqrt.f32 %v300_v12  ;;  %v447_v21 = vpack.c.bf16 %v417_v15, %v415_v54  ;;  %v446_v35 = vpack.c.bf16 %v416_v57, %v414_v45 }
 0x179   :  { %v377_v56 = vmul.f32 %v1479_v28, %v333_v32  ;;  %v980_v4 = vpop.eup %979  ;;  %v301_v17 = vadd.f32 1e-05, %v285_v62  ;;  %v347_v38 = vmul.f32 %v978_v2, %v1354_v33  ;;  %v376_v25 = vmul.f32 %v1477_v13, %v332_v52 }
 0x17a   :  { %v308_v37 = vadd.f32 1e-05, %v292_v63  ;;  %v277_v10 = vpop.xlane.xlu1 %276  ;;  %622 = vmatprep.mubr.bf16.mxu0 %v447_v21  ;;  %v349_v22 = vmul.f32 %v980_v4, %v1360_v40  ;;  %v346_v54 = vmul.f32 %v978_v2, %v1351_v9  ;;  %v982_v42 = vpop.eup %981  ;;  %v418_v45 = vadd.f32 %v1486_v34, %v374_v24 }
 0x17b   :  { %v256_v7 = vpop.xlane.xlu0 %255  ;;  %v421_v55 = vadd.f32 %v1482_v61, %v377_v56  ;;  %991 = vrsqrt.f32 %v301_v17  ;;  %v293_v43 = vmul.f32 0.00390625, %v277_v10  ;;  %623 = vmatmul.mubr.bf16.vlgmr.msra.gmra.mrb[0].mxu0 %v446_v35  ;;  %v391_v33 = vmul.f32 %v1479_v28, %v347_v38 }
 0x17c   :  { %v286_v23 = vmul.f32 0.00390625, %v256_v7  ;;  %993 = vrsqrt.f32 %v308_v37  ;;  %v393_v44 = vmul.f32 %v1479_v28, %v349_v22  ;;  %v420_v9 = vadd.f32 %v1486_v34, %v376_v25  ;;  %v965_v7 = vld [vmem:[#allocation7] sm:$0xff]  }
 0x17d   :  { %v449_v26 = vpack.c.bf16 %v421_v55, %v419_v20  ;;  %v984_v8 = vpop.eup %983  ;;  %v309_v46 = vadd.f32 1e-05, %v293_v43  ;;  %v435_v12 = vadd.f32 %v1482_v61, %v391_v33  ;;  %v348_v29 = vmul.f32 %v980_v4, %v1357_v39 }
 0x17e   :  { %v302_v40 = vadd.f32 1e-05, %v286_v23  ;;  %v986_v3 = vpop.eup %985  ;;  %v259_v49 = vpop.xlane.xlu1 %258  ;;  %v437_v2 = vadd.f32 %v1482_v61, %v393_v44  ;;  %v390_v14 = vmul.f32 %v1477_v13, %v346_v54  ;;  %v335_v15 = vmul.f32 %v982_v42, %v1374_v51 }
 0x17f   :  { %630 = vmatprep.mubr.bf16.mxu0 %v449_v26  ;;  %995 = vrsqrt.f32 %v309_v46  ;;  %v287_v57 = vmul.f32 0.00390625, %v259_v49  ;;  %v448_v32 = vpack.c.bf16 %v420_v9, %v418_v45  ;;  %v337_v52 = vmul.f32 %v984_v8, %v1380_v58 }
 0x180   :  { %997 = vrsqrt.f32 %v302_v40  ;;  %v457_v62 = vpack.c.bf16 %v437_v2, %v435_v12  ;;  %v392_v63 = vmul.f32 %v1477_v13, %v348_v29  ;;  %v434_v20 = vadd.f32 %v1486_v34, %v390_v14  ;;  %v966_v40 = vld [vmem:[#allocation7 + $0x8] sm:$0xff]  }
 0x181   :  { %v988_v21 = vpop.eup %987  ;;  %v303_v35 = vadd.f32 1e-05, %v287_v57  ;;  %v379_v56 = vmul.f32 %v1479_v28, %v335_v15  ;;  %v381_v39 = vmul.f32 %v1479_v28, %v337_v52  ;;  %v351_v4 = vmul.f32 %v986_v3, %v1394_v1 }
 0x182   :  { %v990_v51 = vpop.eup %989  ;;  %662 = vmatprep.mubr.bf16.mxu1 %v457_v62  ;;  %v436_v17 = vadd.f32 %v1486_v34, %v392_v63  ;;  %v353_v58 = vmul.f32 %v988_v21, %v1400_v16  ;;  %v334_v37 = vmul.f32 %v982_v42, %v1371_v50  ;;  %v336_v38 = vmul.f32 %v984_v8, %v1377_v53 }
 0x183   :  { %999 = vrsqrt.f32 %v303_v35  ;;  %631 = vmatmul.mubr.bf16.gmra.mrb[4].mxu0 %v448_v32  ;;  %v423_v24 = vadd.f32 %v1482_v61, %v379_v56  ;;  %v425_v10 = vadd.f32 %v1482_v61, %v381_v39  ;;  %v395_v55 = vmul.f32 %v1479_v28, %v351_v4 }
 0x184   :  { %v456_v1 = vpack.c.bf16 %v436_v17, %v434_v20  ;;  %v397_v22 = vmul.f32 %v1479_v28, %v353_v58  ;;  %v378_v25 = vmul.f32 %v1477_v13, %v334_v37  ;;  %v380_v16 = vmul.f32 %v1477_v13, %v336_v38  ;;  %v967_v20 = vld [vmem:[#allocation7 + $0x10] sm:$0xff]  }
 0x185   :  { %v992_v54 = vpop.eup %991  ;;  %v451_v50 = vpack.c.bf16 %v425_v10, %v423_v24  ;;  %v439_v53 = vadd.f32 %v1482_v61, %v395_v55  ;;  %v350_v42 = vmul.f32 %v986_v3, %v1391_v0  ;;  %v352_v43 = vmul.f32 %v988_v21, %v1397_v11  ;;  %v968_v10 = vld [vmem:[#allocation7 + $0x18] sm:$0xff]  }
 0x186   :  { %v994_v23 = vpop.eup %993  ;;  %663 = vmatmul.mubr.bf16.vlgmr.msra.gmra.mrb[0].mxu1 %v456_v1  ;;  %v441_v33 = vadd.f32 %v1482_v61, %v397_v22  ;;  %v422_v26 = vadd.f32 %v1486_v34, %v378_v25  ;;  %v424_v44 = vadd.f32 %v1486_v34, %v380_v16  ;;  %v339_v45 = vmul.f32 %v990_v51, %v1414_v41 }
 0x187   :  { %638 = vmatprep.mubr.bf16.mxu0 %v451_v50  ;;  %909 = vmatpush3.bf16.msra.mxu1 %v965_v7  ;;  %v394_v8 = vmul.f32 %v1477_v13, %v350_v42  ;;  %v396_v46 = vmul.f32 %v1477_v13, %v352_v43  ;;  %v341_v0 = vmul.f32 %v992_v54, %v1420_v48 }
 0x188   :  { %v459_v11 = vpack.c.bf16 %v441_v33, %v439_v53  ;;  %v450_v12 = vpack.c.bf16 %v424_v44, %v422_v26  ;;  %910 = vmatprep.subr.bf16.mxu1 %v1126_v31  ;;  %v383_v9 = vmul.f32 %v1479_v28, %v339_v45  ;;  %v355_v3 = vmul.f32 %v994_v23, %v1434_v60 }
 0x189   :  { %v996_v49 = vpop.eup %995  ;;  %v438_v41 = vadd.f32 %v1486_v34, %v394_v8  ;;  %v440_v2 = vadd.f32 %v1486_v34, %v396_v46  ;;  %v385_v29 = vmul.f32 %v1479_v28, %v341_v0  ;;  %v338_v14 = vmul.f32 %v990_v51, %v1411_v36 }
 0x18a   :  { %v998_v15 = vpop.eup %997  ;;  %670 = vmatprep.mubr.bf16.mxu1 %v459_v11  ;;  %v427_v48 = vadd.f32 %v1482_v61, %v383_v9  ;;  %v357_v57 = vmul.f32 %v996_v49, %v1440_v19  ;;  %v399_v32 = vmul.f32 %v1479_v28, %v355_v3  ;;  %v340_v52 = vmul.f32 %v992_v54, %v1417_v47 }
 0x18b   :  { %639 = vmatmul.mubr.bf16.gmra.mrb[8].mxu0 %v450_v12  ;;  %v458_v60 = vpack.c.bf16 %v440_v2, %v438_v41  ;;  %911 = vmatpush3.bf16.msra.mxu1 %v966_v40  ;;  %v429_v62 = vadd.f32 %v1482_v61, %v385_v29  ;;  %v382_v63 = vmul.f32 %v1477_v13, %v338_v14 }
 0x18c   :  { %v401_v36 = vmul.f32 %v1479_v28, %v357_v57  ;;  %v443_v21 = vadd.f32 %v1482_v61, %v399_v32  ;;  %912 = vmatprep.subr.bf16.mxu1 %v1126_v31  ;;  %v384_v19 = vmul.f32 %v1477_v13, %v340_v52  ;;  %v354_v35 = vmul.f32 %v994_v23, %v1431_v59 }
 0x18d   :  { %v1000_v56 = vpop.eup %999  ;;  %v453_v47 = vpack.c.bf16 %v429_v62, %v427_v48  ;;  %v426_v39 = vadd.f32 %v1486_v34, %v382_v63  ;;  %v356_v4 = vmul.f32 %v996_v49, %v1437_v18  ;;  %v343_v51 = vmul.f32 %v998_v15, %v1454_v5 }
 0x18e   :  { %671 = vmatmul.mubr.bf16.gmra.mrb[4].mxu1 %v458_v60  ;;  %v445_v17 = vadd.f32 %v1482_v61, %v401_v36  ;;  %v428_v58 = vadd.f32 %v1486_v34, %v384_v19  ;;  %v398_v37 = vmul.f32 %v1477_v13, %v354_v35  ;;  %v345_v38 = vmul.f32 %v1000_v56, %v1460_v30 }
 0x18f   :  { %646 = vmatprep.mubr.bf16.mxu0 %v453_v47  ;;  %v400_v59 = vmul.f32 %v1477_v13, %v356_v4  ;;  %913 = vmatpush3.bf16.msra.mxu1 %v967_v20  ;;  %v387_v24 = vmul.f32 %v1479_v28, %v343_v51  ;;  %v342_v18 = vmul.f32 %v998_v15, %v1451_v27 }
 0x190   :  { %v461_v7 = vpack.c.bf16 %v445_v17, %v443_v21  ;;  %v389_v5 = vmul.f32 %v1479_v28, %v345_v38  ;;  %914 = vmatprep.subr.bf16.mxu1 %v1126_v31  ;;  %v452_v55 = vpack.c.bf16 %v428_v58, %v426_v39  ;;  %v442_v1 = vadd.f32 %v1486_v34, %v398_v37 }
 0x191   :  { %v444_v22 = vadd.f32 %v1486_v34, %v400_v59  ;;  %v344_v30 = vmul.f32 %v1000_v56, %v1457_v6  ;;  %v431_v25 = vadd.f32 %v1482_v61, %v387_v24  ;;  %v386_v27 = vmul.f32 %v1477_v13, %v342_v18  ;;  %v707_v6 = vld [vmem:[%s1620_s1] sm:$0x3]  ;;  %s1128_s1 = smov [#allocation9]  }
 0x192   :  { %678 = vmatprep.mubr.bf16.mxu1 %v461_v7  ;;  %v433_v16 = vadd.f32 %v1482_v61, %v389_v5  ;;  %v708_v43 = vpack.c.bf16 %v707_v6, %v707_v6  ;;  %s804_s19 = sshll.u32 %s1128_s1, 4  ;;  %s805_s19 = int_to_ptr.vmem [resolvable:$true] %s804_s19 }
 0x193   :  { %647 = vmatmul.mubr.bf16.gmra.mrb[12].mxu0 %v452_v55  ;;  %v460_v54 = vpack.c.bf16 %v444_v22, %v442_v1  ;;  %915 = vmatpush3.bf16.msra.mxu1 %v968_v10  ;;  %v388_v28 = vmul.f32 %v1477_v13, %v344_v30  ;;  %v430_v42 = vadd.f32 %v1486_v34, %v386_v27  ;;  %s1067_s22 = scalar_lea.vmem %s805_s19, 32  ;;  %p1072_p11 = scmp.lt.s32.totalorder %s805_s19, %s805_s19 }
 0x194   :  { %v455_v50 = vpack.c.bf16 %v433_v16, %v431_v25  ;;  %p1068_p10 = scmp.ne.s32.totalorder %s805_s19, %s1067_s22  ;;  %p1073_p12 = scmp.lt.s32.totalorder %s1067_s22, %s1067_s22 }
 0x195   :  { %v432_v53 = vadd.f32 %v1486_v34, %v388_v28 }
 0x196   :  { %679 = vmatmul.mubr.bf16.gmra.mrb[8].mxu1 %v460_v54  ;;  %654 = vmatprep.mubr.bf16.mxu0 %v455_v50  ;;  %p1074_p13 = por %p1073_p12, %p1072_p11 }
 0x197   :  { %916 = vmatprep.mubr.msk.bf16.mxu1 %vm1127_vm0, %v1126_v31  ;;  %v454_v61 = vpack.c.bf16 %v432_v53, %v430_v42 }
 0x198   :  { %p1075_p0 = pnand %p1074_p13, %p1068_p10 }
 0x19b   :  { %655 = vmatmul.mubr.bf16.gmra.mrb[16].mxu0 %v454_v61 }
 0x19e   :  { %917 = vmatmul.mubr.msk.bf16.vlgmr.msra.gmra.mrb[12].mxu1 %vm741_vm1, %v708_v43 }
 0x24e   :  { %v855_v13 = vpop.f32.mrb[0].mxu0 }
 0x24f   :  { %v856_v23 = vpop.f32.mrb[1].mxu0 }
 0x250   :  { %v857_v33 = vadd.f32 %v856_v23, %v855_v13  ;;  %v858_v26 = vpop.f32.mrb[2].mxu0 }
 0x251   :  { %v859_v44 = vpop.f32.mrb[3].mxu0 }
 0x252   :  { %687 = vst [vmem:[#allocation8] sm:$0xff] %v857_v33  ;;  %v860_v45 = vadd.f32 %v859_v44, %v858_v26 }
 0x254   :  { %688 = vst [vmem:[#allocation8 + $0x8] sm:$0xff] %v860_v45 }
 0x256   :  { %v861_v34 = vpop.f32.mrb[4].mxu0 }
 0x257   :  { %v862_v8 = vpop.f32.mrb[5].mxu0 }
 0x258   :  { %v863_v31 = vadd.f32 %v862_v8, %v861_v34  ;;  %v864_v46 = vpop.f32.mrb[6].mxu0 }
 0x259   :  { %v885_v40 = vpop.f32.mrb[0].mxu1  ;;  %v865_v0 = vpop.f32.mrb[7].mxu0 }
 0x25a   :  { %689 = vst [vmem:[#allocation8 + $0x10] sm:$0xff] %v863_v31  ;;  %v886_v11 = vpop.f32.mrb[1].mxu1  ;;  %v866_v12 = vadd.f32 %v865_v0, %v864_v46 }
 0x25b   :  { %v887_v9 = vadd.f32 %v886_v11, %v885_v40  ;;  %v888_v3 = vpop.f32.mrb[2].mxu1 }
 0x25c   :  { %690 = vst [vmem:[#allocation8 + $0x18] sm:$0xff] %v866_v12  ;;  %v889_v49 = vpop.f32.mrb[3].mxu1 }
 0x25d   :  { %697 = vst [vmem:[#allocation8 + $0x50] sm:$0xff] %v887_v9  ;;  %v890_v41 = vadd.f32 %v889_v49, %v888_v3 }
 0x25e   :  { %v867_v2 = vpop.f32.mrb[8].mxu0 }
 0x25f   :  { %698 = vst [vmem:[#allocation8 + $0x58] sm:$0xff] %v890_v41  ;;  %v868_v29 = vpop.f32.mrb[9].mxu0 }
 0x260   :  { %v869_v14 = vadd.f32 %v868_v29, %v867_v2  ;;  %v870_v15 = vpop.f32.mrb[10].mxu0 }
 0x261   :  { %v891_v48 = vpop.f32.mrb[4].mxu1  ;;  %v871_v57 = vpop.f32.mrb[11].mxu0 }
 0x262   :  { %691 = vst [vmem:[#allocation8 + $0x20] sm:$0xff] %v869_v14  ;;  %v892_v32 = vpop.f32.mrb[5].mxu1  ;;  %v872_v52 = vadd.f32 %v871_v57, %v870_v15 }
 0x263   :  { %v893_v60 = vadd.f32 %v892_v32, %v891_v48  ;;  %v894_v62 = vpop.f32.mrb[6].mxu1 }
 0x264   :  { %692 = vst [vmem:[#allocation8 + $0x28] sm:$0xff] %v872_v52  ;;  %v895_v63 = vpop.f32.mrb[7].mxu1 }
 0x265   :  { %699 = vst [vmem:[#allocation8 + $0x60] sm:$0xff] %v893_v60  ;;  %v896_v20 = vadd.f32 %v895_v63, %v894_v62 }
 0x266   :  { %v873_v36 = vpop.f32.mrb[12].mxu0 }
 0x267   :  { %700 = vst [vmem:[#allocation8 + $0x68] sm:$0xff] %v896_v20  ;;  %v874_v21 = vpop.f32.mrb[13].mxu0 }
 0x268   :  { %v875_v19 = vadd.f32 %v874_v21, %v873_v36  ;;  %v876_v35 = vpop.f32.mrb[14].mxu0 }
 0x269   :  { %v897_v56 = vpop.f32.mrb[8].mxu1  ;;  %v877_v47 = vpop.f32.mrb[15].mxu0 }
 0x26a   :  { %693 = vst [vmem:[#allocation8 + $0x30] sm:$0xff] %v875_v19  ;;  %v898_v39 = vpop.f32.mrb[9].mxu1  ;;  %v878_v4 = vadd.f32 %v877_v47, %v876_v35 }
 0x26b   :  { %v899_v51 = vadd.f32 %v898_v39, %v897_v56  ;;  %v900_v17 = vpop.f32.mrb[10].mxu1 }
 0x26c   :  { %694 = vst [vmem:[#allocation8 + $0x38] sm:$0xff] %v878_v4  ;;  %v901_v58 = vpop.f32.mrb[11].mxu1 }
 0x26d   :  { %701 = vst [vmem:[#allocation8 + $0x70] sm:$0xff] %v899_v51  ;;  %v902_v37 = vadd.f32 %v901_v58, %v900_v17 }
 0x26e   :  { %v879_v38 = vpop.f32.mrb[16].mxu0 }
 0x26f   :  { %702 = vst [vmem:[#allocation8 + $0x78] sm:$0xff] %v902_v37  ;;  %v880_v59 = vpop.f32.mrb[17].mxu0 }
 0x270   :  { %v881_v24 = vadd.f32 %v880_v59, %v879_v38  ;;  %v882_v10 = vpop.f32.mrb[18].mxu0 }
 0x271   :  { %v779_v18 = vpop.f32.mrb[12].mxu1  ;;  %v883_v7 = vpop.f32.mrb[19].mxu0 }
 0x272   :  { %695 = vst [vmem:[#allocation8 + $0x40] sm:$0xff] %v881_v24  ;;  %785 = vst [vmem:[#allocation9] sm:$0x3] %v779_v18  ;;  %v918_v5 = vpop.f32.mrb[13].mxu1  ;;  %v884_v55 = vadd.f32 %v883_v7, %v882_v10 }
 0x273   :  { %v782_v1 = vpop.f32.mrb[14].mxu1 }
 0x274   :  { %1078 = shalt.err (!%p1075_p0)
}
 0x275   :  { %s1079_s4 = scalar_lea.hbm %s1626_s7, 32 }
 0x276   :  { %p1080_p1 = scmp.ne.s32.totalorder %s1626_s7, %s1079_s4  ;;  %p1083_p2 = scmp.lt.u32.totalorder %s1079_s4, %s1626_s7 }
 0x278   :  { %p1085_p3 = pnand %p1083_p2, %p1080_p1 }
 0x27a   :  { %1088 = shalt.err (!%p1085_p3)
}
 0x27b   :  { %807 = dma.vmem_to_hbm [thread:$0]  %s805_s19, 32, %s1626_s7, [#allocation10]   ;;  %696 = vst [vmem:[#allocation8 + $0x48] sm:$0xff] %v884_v55  ;;  %v919_v22 = vpop.f32.mrb[15].mxu1 }
 0x27c   :  { %s1089_s8 = scalar_lea.vmem %s1588_s21, 2048  ;;  %p1094_p5 = scmp.lt.s32.totalorder %s1588_s21, %s1588_s21 }
 0x27d   :  { %p1090_p4 = scmp.ne.s32.totalorder %s1588_s21, %s1089_s8  ;;  %p1095_p6 = scmp.lt.s32.totalorder %s1089_s8, %s1089_s8 }
 0x27f   :  { %p1096_p7 = por %p1095_p6, %p1094_p5 }
 0x281   :  { %p1097_p8 = pnand %p1096_p7, %p1090_p4 }
 0x283   :  { %1100 = shalt.err (!%p1097_p8)
}
 0x284   :  { %s1101_s13 = scalar_lea.hbm %s1625_s6, 2048 }
 0x285   :  { %p1102_p9 = scmp.ne.s32.totalorder %s1625_s6, %s1101_s13  ;;  %p1105_p10 = scmp.lt.u32.totalorder %s1101_s13, %s1625_s6 }
 0x287   :  { %p1107_p11 = pnand %p1105_p10, %p1102_p9 }
 0x289   :  { %1110 = shalt.err (!%p1107_p11)
}
 0x28a   :  { %s1130_s0 = smov 128   ;;  %s1131_s16 = smov 8  }
 0x28b   :  { %797 = dma.vmem_to_hbm [thread:$0]  %s1588_s21, 2048, %s1625_s6, [#allocation4], %s1130_s0, %s1130_s0, %s1131_s16  }
 0x28c   :  { %1115 = dma.done.wait [#allocation4], 2048  }
 0x28d   :  { %1116 = vsyncadd [#allocation4], 4294965248 }
 0x28e   :  { %1117 = dma.done.wait [#allocation10], 32  }
 0x28f   :  { %1118 = vsyncadd [#allocation10], 4294967264 }
 0x290   :  { %814 = vsyncpa [#allocation3], 1 }
 0x291   :  { %815 = vsyncpa [#allocation6], 1 }
 0x292   :  { %816 = vsyncpa [#allocation4], 1 }
 0x293   :  { %817 = vsyncpa [#allocation10], 1 }

</bundles_post_ra>
